<compile_context>
chip_gen: v6e
topology: v6e:2x2x1
jax: 0.10.0
libtpu: 0.0.40
codegen_flags: <defaults>
</compile_context>

<pallas_src>
import jax
import jax.numpy as jnp
from jax.experimental import pallas as pl
from jax.experimental.pallas import tpu as pltpu

LANE = 128       # lane width: last dims padded to a multiple of this
SUBLANE = 8      # f32 sublane packing: batch tile must be a multiple of this
MAX_TILE_B = 512 # batch rows per grid step (sized well inside 16 MiB scoped VMEM)


def _round_up(x, m):
    return ((x + m - 1) // m) * m


def _make_mlp_kernel(n_linear):
    """Kernel for an MLP with `n_linear` Linear layers.

    Ref order: x, (w0, b0), (w1, b1), ..., out
    ReLU after every Linear except the last (matches General_Network.stack).
    All refs are already lane-dense (last dim % 128 == 0).
    """

    def kernel(*refs):
        x_ref = refs[0]
        out_ref = refs[-1]
        h = x_ref[...]
        for i in range(n_linear):
            w = refs[1 + 2 * i][...]
            b = refs[2 + 2 * i][...]
            h = jnp.dot(h, w, preferred_element_type=jnp.float32) + b
            if i < n_linear - 1:
                h = jnp.maximum(h, 0.0)
        out_ref[...] = h.astype(out_ref.dtype)

    return kernel


def init_general_network_params(key, n_states, n_actions, layer_list):
    """Deterministic init matching the shapes of General_Network.__init__.

    Mimics PyTorch's default Linear init (uniform(-1/sqrt(fan_in), 1/sqrt(fan_in))).
    Weights are stored as (in, out) so the kernel does x @ W + b.
    """
    dims = [n_states] + list(layer_list) + [n_actions]
    params = []
    for i in range(len(dims) - 1):
        fan_in, fan_out = dims[i], dims[i + 1]
        key, kw, kb = jax.random.split(key, 3)
        bound = 1.0 / jnp.sqrt(jnp.float32(fan_in))
        w = jax.random.uniform(kw, (fan_in, fan_out), jnp.float32, -bound, bound)
        b = jax.random.uniform(kb, (1, fan_out), jnp.float32, -bound, bound)
        params.append((w, b))
    return params


@jax.jit
def general_network_forward(x, params):
    """Whole MLP in one pallas_call, gridded over the batch dimension."""
    batch, n_states = x.shape
    n_actions = params[-1][0].shape[1]
    n_linear = len(params)

    # --- Zero-pad weights/biases so every feature dim is a multiple of 128. ---
    padded = []
    for w, b in params:
        fi, fo = w.shape
        fi_p, fo_p = _round_up(fi, LANE), _round_up(fo, LANE)
        w_p = jnp.pad(w.astype(jnp.float32), ((0, fi_p - fi), (0, fo_p - fo)))
        b_p = jnp.pad(b.astype(jnp.float32), ((0, 0), (0, fo_p - fo)))
        padded.append((w_p, b_p))

    ns_p = _round_up(n_states, LANE)
    na_p = padded[-1][0].shape[1]  # padded output width (lane-dense store)

    # --- Batch tiling: small batches -> one tile; large batches -> 512-row tiles. ---
    tile_b = MAX_TILE_B if batch >= MAX_TILE_B else _round_up(batch, SUBLANE)
    batch_p = _round_up(batch, tile_b)
    x_p = jnp.pad(x.astype(jnp.float32),
                  ((0, batch_p - batch), (0, ns_p - n_states)))

    flat_inputs = [x_p]
    in_specs = [pl.BlockSpec((tile_b, ns_p), lambda i: (i, 0))]
    for w_p, b_p in padded:
        flat_inputs += [w_p, b_p]
        # Constant index_map: weights/biases stay resident in VMEM across grid steps.
        in_specs += [
            pl.BlockSpec(w_p.shape, lambda i: (0, 0)),
            pl.BlockSpec(b_p.shape, lambda i: (0, 0)),
        ]

    out_p = pl.pallas_call(
        _make_mlp_kernel(n_linear),
        grid=(batch_p // tile_b,),
        in_specs=in_specs,
        out_specs=pl.BlockSpec((tile_b, na_p), lambda i: (i, 0)),
        out_shape=jax.ShapeDtypeStruct((batch_p, na_p), jnp.float32),
        compiler_params=pltpu.CompilerParams(
            dimension_semantics=("parallel",)),  # shards batch tiles across TCs (v7x)
    )(*flat_inputs)

    # Slice away batch padding and the zero-padded output columns.
    return out_p[:batch, :n_actions]


def _reference_forward(x, params):
    h = x
    n = len(params)
    for i, (w, b) in enumerate(params):
        h = h @ w + b
        if i < n - 1:
            h = jnp.maximum(h, 0.0)
    return h


if __name__ == "__main__":
    # Small shapes consistent with the module's forward: x is (batch, n_states).
    n_states = 32
    n_actions = 8
    layer_list = [64, 32]
    batch = 8

    key = jax.random.PRNGKey(0)
    key, kx = jax.random.split(key)
    x = jax.random.normal(kx, (batch, n_states), jnp.float32)

    params = init_general_network_params(key, n_states, n_actions, layer_list)

    out = general_network_forward(x, params)
    out = jax.block_until_ready(out)

    ref = _reference_forward(x, params)
    assert out.shape == (batch, n_actions), out.shape
    assert jnp.allclose(out, ref, atol=1e-4, rtol=1e-4), "mismatch vs reference"

    # Larger batch: exercises grid > 1 (batch tiling + padding + parallel axis).
    big_batch = 1040
    key, kx2 = jax.random.split(key)
    x_big = jax.random.normal(kx2, (big_batch, n_states), jnp.float32)
    out_big = jax.block_until_ready(general_network_forward(x_big, params))
    ref_big = _reference_forward(x_big, params)
    assert out_big.shape == (big_batch, n_actions), out_big.shape
    assert jnp.allclose(out_big, ref_big, atol=1e-4, rtol=1e-4), "mismatch (big batch)"

    print("KERNEL_OK")
</pallas_src>

<mosaic_0001>
module attributes {stable_mosaic.version = 11 : i64} {
  func.func @kernel(%arg0: i32, %arg1: memref<8x128xf32, #tpu.memory_space<vmem>>, %arg2: memref<128x128xf32, #tpu.memory_space<vmem>>, %arg3: memref<1x128xf32, #tpu.memory_space<vmem>>, %arg4: memref<128x128xf32, #tpu.memory_space<vmem>>, %arg5: memref<1x128xf32, #tpu.memory_space<vmem>>, %arg6: memref<128x128xf32, #tpu.memory_space<vmem>>, %arg7: memref<1x128xf32, #tpu.memory_space<vmem>>, %arg8: memref<8x128xf32, #tpu.memory_space<vmem>>) attributes {dimension_semantics = [#tpu.dimension_semantics<parallel>], iteration_bounds = array<i64: 1>, scalar_prefetch = 0 : i64, scratch_operands = 0 : i64, tpu.core_type = #tpu.core_type<tc>, window_params = [{transform_indices = @transform_0, window_bounds = array<i64: 8, 128>}, {pipeline_mode = #tpu.pipeline_mode<synchronous>, transform_indices = @transform_1, window_bounds = array<i64: 128, 128>}, {pipeline_mode = #tpu.pipeline_mode<synchronous>, transform_indices = @transform_2, window_bounds = array<i64: 1, 128>}, {pipeline_mode = #tpu.pipeline_mode<synchronous>, transform_indices = @transform_3, window_bounds = array<i64: 128, 128>}, {pipeline_mode = #tpu.pipeline_mode<synchronous>, transform_indices = @transform_4, window_bounds = array<i64: 1, 128>}, {pipeline_mode = #tpu.pipeline_mode<synchronous>, transform_indices = @transform_5, window_bounds = array<i64: 128, 128>}, {pipeline_mode = #tpu.pipeline_mode<synchronous>, transform_indices = @transform_6, window_bounds = array<i64: 1, 128>}, {transform_indices = @transform_7, window_bounds = array<i64: 8, 128>}]} {
    %c0 = arith.constant 0 : index
    %c0_0 = arith.constant 0 : index
    %0 = vector.load %arg1[%c0, %c0_0] : memref<8x128xf32, #tpu.memory_space<vmem>>, vector<8x128xf32>
    %c0_1 = arith.constant 0 : index
    %c0_2 = arith.constant 0 : index
    %1 = vector.load %arg2[%c0_1, %c0_2] : memref<128x128xf32, #tpu.memory_space<vmem>>, vector<128x128xf32>
    %c0_3 = arith.constant 0 : index
    %c0_4 = arith.constant 0 : index
    %2 = vector.load %arg3[%c0_3, %c0_4] : memref<1x128xf32, #tpu.memory_space<vmem>>, vector<1x128xf32>
    %cst = arith.constant dense<0.000000e+00> : vector<8x128xf32>
    %3 = tpu.matmul %0, %1, %cst {dimension_numbers = #tpu.dot_dimension_numbers<[1], [0], [0], [1], [0, 0, 1, 1], [], []>} : vector<8x128xf32>, vector<128x128xf32>, vector<8x128xf32> -> vector<8x128xf32>
    %4 = vector.broadcast %2 : vector<1x128xf32> to vector<8x128xf32>
    %5 = arith.addf %3, %4 : vector<8x128xf32>
    %cst_5 = arith.constant 0.000000e+00 : f32
    %6 = vector.broadcast %cst_5 : f32 to vector<8x128xf32>
    %7 = arith.maximumf %5, %6 : vector<8x128xf32>
    %c0_6 = arith.constant 0 : index
    %c0_7 = arith.constant 0 : index
    %8 = vector.load %arg4[%c0_6, %c0_7] : memref<128x128xf32, #tpu.memory_space<vmem>>, vector<128x128xf32>
    %c0_8 = arith.constant 0 : index
    %c0_9 = arith.constant 0 : index
    %9 = vector.load %arg5[%c0_8, %c0_9] : memref<1x128xf32, #tpu.memory_space<vmem>>, vector<1x128xf32>
    %cst_10 = arith.constant dense<0.000000e+00> : vector<8x128xf32>
    %10 = tpu.matmul %7, %8, %cst_10 {dimension_numbers = #tpu.dot_dimension_numbers<[1], [0], [0], [1], [0, 0, 1, 1], [], []>} : vector<8x128xf32>, vector<128x128xf32>, vector<8x128xf32> -> vector<8x128xf32>
    %11 = vector.broadcast %9 : vector<1x128xf32> to vector<8x128xf32>
    %12 = arith.addf %10, %11 : vector<8x128xf32>
    %cst_11 = arith.constant 0.000000e+00 : f32
    %13 = vector.broadcast %cst_11 : f32 to vector<8x128xf32>
    %14 = arith.maximumf %12, %13 : vector<8x128xf32>
    %c0_12 = arith.constant 0 : index
    %c0_13 = arith.constant 0 : index
    %15 = vector.load %arg6[%c0_12, %c0_13] : memref<128x128xf32, #tpu.memory_space<vmem>>, vector<128x128xf32>
    %c0_14 = arith.constant 0 : index
    %c0_15 = arith.constant 0 : index
    %16 = vector.load %arg7[%c0_14, %c0_15] : memref<1x128xf32, #tpu.memory_space<vmem>>, vector<1x128xf32>
    %cst_16 = arith.constant dense<0.000000e+00> : vector<8x128xf32>
    %17 = tpu.matmul %14, %15, %cst_16 {dimension_numbers = #tpu.dot_dimension_numbers<[1], [0], [0], [1], [0, 0, 1, 1], [], []>} : vector<8x128xf32>, vector<128x128xf32>, vector<8x128xf32> -> vector<8x128xf32>
    %18 = vector.broadcast %16 : vector<1x128xf32> to vector<8x128xf32>
    %19 = arith.addf %17, %18 : vector<8x128xf32>
    %c0_17 = arith.constant 0 : index
    %c0_18 = arith.constant 0 : index
    %20 = vector.load %arg8[%c0_17, %c0_18] : memref<8x128xf32, #tpu.memory_space<vmem>>, vector<8x128xf32>
    tpu.vector_store %arg8[%c0_17, %c0_18], %19 {strides = array<i32>} : memref<8x128xf32, #tpu.memory_space<vmem>>, vector<8x128xf32>,
    return
  }
  func.func @transform_0(%arg0: i32) -> (i32, i32) {
    %c0_i32 = arith.constant 0 : i32
    %c0_i32_0 = arith.constant 0 : i32
    return %arg0, %c0_i32 : i32, i32
  }
  func.func @transform_1(%arg0: i32) -> (i32, i32) {
    %c0_i32 = arith.constant 0 : i32
    %c0_i32_0 = arith.constant 0 : i32
    %c0_i32_1 = arith.constant 0 : i32
    return %c0_i32, %c0_i32_0 : i32, i32
  }
  func.func @transform_2(%arg0: i32) -> (i32, i32) {
    %c0_i32 = arith.constant 0 : i32
    %c0_i32_0 = arith.constant 0 : i32
    %c0_i32_1 = arith.constant 0 : i32
    return %c0_i32, %c0_i32_0 : i32, i32
  }
  func.func @transform_3(%arg0: i32) -> (i32, i32) {
    %c0_i32 = arith.constant 0 : i32
    %c0_i32_0 = arith.constant 0 : i32
    %c0_i32_1 = arith.constant 0 : i32
    return %c0_i32, %c0_i32_0 : i32, i32
  }
  func.func @transform_4(%arg0: i32) -> (i32, i32) {
    %c0_i32 = arith.constant 0 : i32
    %c0_i32_0 = arith.constant 0 : i32
    %c0_i32_1 = arith.constant 0 : i32
    return %c0_i32, %c0_i32_0 : i32, i32
  }
  func.func @transform_5(%arg0: i32) -> (i32, i32) {
    %c0_i32 = arith.constant 0 : i32
    %c0_i32_0 = arith.constant 0 : i32
    %c0_i32_1 = arith.constant 0 : i32
    return %c0_i32, %c0_i32_0 : i32, i32
  }
  func.func @transform_6(%arg0: i32) -> (i32, i32) {
    %c0_i32 = arith.constant 0 : i32
    %c0_i32_0 = arith.constant 0 : i32
    %c0_i32_1 = arith.constant 0 : i32
    return %c0_i32, %c0_i32_0 : i32, i32
  }
  func.func @transform_7(%arg0: i32) -> (i32, i32) {
    %c0_i32 = arith.constant 0 : i32
    %c0_i32_0 = arith.constant 0 : i32
    return %arg0, %c0_i32 : i32, i32
  }
}

</mosaic_0001>

<bundles_post_ra>
// kernel: general_network_forward.1
= control target key start
LH: loop header
LB: loop body
LE: loop exit
PB: predicated region body
PF: predicated region fallthrough
CT: control target
= control target key end

     0   :  { %v508_v1 = vmov 0.0   ;;  %vm509_vm0 = vmmov 0   ;;  %s764_s0 = inlined_call_operand.vmem [shape: f32[8,128], index: 0, kind: input, shape index: {}]   ;;  %s765_s1 = inlined_call_operand.vmem [shape: f32[128,128], index: 1, kind: input, shape index: {}]   ;;  %s766_s2 = inlined_call_operand.vmem [shape: f32[1,128], index: 2, kind: input, shape index: {}]   ;;  %s767_s3 = inlined_call_operand.vmem [shape: f32[128,128], index: 3, kind: input, shape index: {}]   ;;  %s768_s4 = inlined_call_operand.vmem [shape: f32[1,128], index: 4, kind: input, shape index: {}]   ;;  %s769_s5 = inlined_call_operand.vmem [shape: f32[128,128], index: 5, kind: input, shape index: {}]   ;;  %s770_s6 = inlined_call_operand.vmem [shape: f32[1,128], index: 6, kind: input, shape index: {}]   ;;  %s771_s7 = inlined_call_operand.hbm [shape: f32[8,128], index: 7, kind: output, shape index: {}]  }
   0x1   :  { %v43_v0 = vld [vmem:[%s765_s1 + $0x78] sm:$0xff]  ;;  %378 = vmatprep.subr.mxu0 %v508_v1  ;;  %v42_v2 = vld [vmem:[%s765_s1 + $0x70] sm:$0xff]  ;;  %410 = vmatprep.mubr.msk.f32.mxu0 %vm509_vm0, %v508_v1  ;;  %v41_v3 = vld [vmem:[%s765_s1 + $0x68] sm:$0xff] }
   0x2   :  { %379 = vmatpush3.msra.mxu0 %v43_v0  ;;  %413 = vmatprep.subr.mxu1 %v508_v1  ;;  %v40_v4 = vld [vmem:[%s765_s1 + $0x60] sm:$0xff]  ;;  %v137_v5 = vld [vmem:[%s767_s3 + $0x78] sm:$0xff]  ;;  %v136_v6 = vld [vmem:[%s767_s3 + $0x70] sm:$0xff] }
   0x3   :  { %380 = vmatprep.subr.mxu0 %v508_v1  ;;  %445 = vmatprep.mubr.msk.f32.mxu1 %vm509_vm0, %v508_v1  ;;  %v39_v7 = vld [vmem:[%s765_s1 + $0x58] sm:$0xff]  ;;  %v135_v8 = vld [vmem:[%s767_s3 + $0x68] sm:$0xff]  ;;  %v38_v9 = vld [vmem:[%s765_s1 + $0x50] sm:$0xff] }
   0x4   :  { %381 = vmatpush3.msra.mxu0 %v42_v2  ;;  %414 = vmatpush3.msra.mxu1 %v137_v5  ;;  %v134_v10 = vld [vmem:[%s767_s3 + $0x60] sm:$0xff] }
   0x5   :  { %382 = vmatprep.subr.mxu0 %v508_v1  ;;  %415 = vmatprep.subr.mxu1 %v508_v1 }
   0x6   :  { %383 = vmatpush3.msra.mxu0 %v41_v3  ;;  %416 = vmatpush3.msra.mxu1 %v136_v6 }
   0x7   :  { %384 = vmatprep.subr.mxu0 %v508_v1  ;;  %417 = vmatprep.subr.mxu1 %v508_v1 }
   0x8   :  { %385 = vmatpush3.msra.mxu0 %v40_v4  ;;  %418 = vmatpush3.msra.mxu1 %v135_v8 }
   0x9   :  { %386 = vmatprep.subr.mxu0 %v508_v1 }
   0xa   :  { %387 = vmatpush3.msra.mxu0 %v39_v7 }
   0xb   :  { %12 = vsyncpa [#allocation3], 0  ;;  %388 = vmatprep.subr.mxu0 %v508_v1  ;;  %v37_v11 = vld [vmem:[%s765_s1 + $0x48] sm:$0xff]  ;;  %419 = vmatprep.subr.mxu1 %v508_v1  ;;  %v133_v12 = vld [vmem:[%s767_s3 + $0x58] sm:$0xff]  ;;  %s510_s29 = smov [#allocation2]  }
   0xc   :  { %389 = vmatpush3.msra.mxu0 %v38_v9  ;;  %420 = vmatpush3.msra.mxu1 %v134_v10  ;;  %v36_v13 = vld [vmem:[%s765_s1 + $0x40] sm:$0xff]  ;;  %v132_v14 = vld [vmem:[%s767_s3 + $0x50] sm:$0xff]  ;;  %v35_v15 = vld [vmem:[%s765_s1 + $0x38] sm:$0xff]  ;;  %s316_s30 = sshll.u32 %s510_s29, 4  ;;  %s317_s30 = int_to_ptr.vmem [resolvable:$true] %s316_s30 }
   0xd   :  { %390 = vmatprep.subr.mxu0 %v508_v1  ;;  %421 = vmatprep.subr.mxu1 %v508_v1  ;;  %v131_v16 = vld [vmem:[%s767_s3 + $0x48] sm:$0xff]  ;;  %v34_v17 = vld [vmem:[%s765_s1 + $0x30] sm:$0xff]  ;;  %v130_v18 = vld [vmem:[%s767_s3 + $0x40] sm:$0xff]  ;;  %p491_p1 = scmp.lt.s32.totalorder %s317_s30, %s317_s30 }
   0xe   :  { %391 = vmatpush3.msra.mxu0 %v37_v11  ;;  %422 = vmatpush3.msra.mxu1 %v133_v12  ;;  %v33_v19 = vld [vmem:[%s765_s1 + $0x28] sm:$0xff]  ;;  %v129_v20 = vld [vmem:[%s767_s3 + $0x38] sm:$0xff]  ;;  %v32_v21 = vld [vmem:[%s765_s1 + $0x20] sm:$0xff] }
   0xf   :  { %392 = vmatprep.subr.mxu0 %v508_v1  ;;  %423 = vmatprep.subr.mxu1 %v508_v1  ;;  %v128_v22 = vld [vmem:[%s767_s3 + $0x30] sm:$0xff]  ;;  %v31_v23 = vld [vmem:[%s765_s1 + $0x18] sm:$0xff]  ;;  %v127_v24 = vld [vmem:[%s767_s3 + $0x28] sm:$0xff] }
  0x10   :  { %393 = vmatpush3.msra.mxu0 %v36_v13  ;;  %424 = vmatpush3.msra.mxu1 %v132_v14  ;;  %v30_v25 = vld [vmem:[%s765_s1 + $0x10] sm:$0xff]  ;;  %v126_v26 = vld [vmem:[%s767_s3 + $0x20] sm:$0xff]  ;;  %v29_v27 = vld [vmem:[%s765_s1 + $0x8] sm:$0xff] }
  0x11   :  { %394 = vmatprep.subr.mxu0 %v508_v1  ;;  %425 = vmatprep.subr.mxu1 %v508_v1  ;;  %v125_v28 = vld [vmem:[%s767_s3 + $0x18] sm:$0xff]  ;;  %v28_v29 = vld [vmem:[%s765_s1] sm:$0xff]  ;;  %v124_v31 = vld [vmem:[%s767_s3 + $0x10] sm:$0xff] }
  0x12   :  { %395 = vmatpush3.msra.mxu0 %v35_v15  ;;  %426 = vmatpush3.msra.mxu1 %v131_v16  ;;  %v27_v30 = vld [vmem:[%s764_s0] sm:$0xff]  ;;  %v123_v32 = vld [vmem:[%s767_s3 + $0x8] sm:$0xff]  ;;  %v231_v34 = vld [vmem:[%s769_s5 + $0x78] sm:$0xff] }
  0x13   :  { %396 = vmatprep.subr.mxu0 %v508_v1  ;;  %427 = vmatprep.subr.mxu1 %v508_v1  ;;  %v122_v33 = vld [vmem:[%s767_s3] sm:$0xff]  ;;  %v230_v35 = vld [vmem:[%s769_s5 + $0x70] sm:$0xff]  ;;  %v229_v36 = vld [vmem:[%s769_s5 + $0x68] sm:$0xff] }
  0x14   :  { %397 = vmatpush3.msra.mxu0 %v34_v17  ;;  %428 = vmatpush3.msra.mxu1 %v130_v18  ;;  %v228_v37 = vld [vmem:[%s769_s5 + $0x60] sm:$0xff]  ;;  %v227_v38 = vld [vmem:[%s769_s5 + $0x58] sm:$0xff]  ;;  %v226_v39 = vld [vmem:[%s769_s5 + $0x50] sm:$0xff] }
  0x15   :  { %398 = vmatprep.subr.mxu0 %v508_v1  ;;  %429 = vmatprep.subr.mxu1 %v508_v1  ;;  %v225_v40 = vld [vmem:[%s769_s5 + $0x48] sm:$0xff]  ;;  %v224_v41 = vld [vmem:[%s769_s5 + $0x40] sm:$0xff]  ;;  %v223_v42 = vld [vmem:[%s769_s5 + $0x38] sm:$0xff] }
  0x16   :  { %399 = vmatpush3.msra.mxu0 %v33_v19  ;;  %430 = vmatpush3.msra.mxu1 %v129_v20  ;;  %v222_v43 = vld [vmem:[%s769_s5 + $0x30] sm:$0xff]  ;;  %v221_v44 = vld [vmem:[%s769_s5 + $0x28] sm:$0xff]  ;;  %v220_v45 = vld [vmem:[%s769_s5 + $0x20] sm:$0xff] }
  0x17   :  { %400 = vmatprep.subr.mxu0 %v508_v1  ;;  %431 = vmatprep.subr.mxu1 %v508_v1  ;;  %v219_v46 = vld [vmem:[%s769_s5 + $0x18] sm:$0xff]  ;;  %v324_v47 = vld [vmem:[%s766_s2] ss:$0 sm:$0xff]  ;;  %v218_v52 = vld [vmem:[%s769_s5 + $0x10] sm:$0xff] }
  0x18   :  { %401 = vmatpush3.msra.mxu0 %v32_v21  ;;  %432 = vmatpush3.msra.mxu1 %v128_v22  ;;  %v217_v53 = vld [vmem:[%s769_s5 + $0x8] sm:$0xff]  ;;  %v216_v54 = vld [vmem:[%s769_s5] sm:$0xff]  ;;  %s486_s5 = scalar_lea.vmem %s317_s30, 128 }
  0x19   :  { %402 = vmatprep.subr.mxu0 %v508_v1  ;;  %433 = vmatprep.subr.mxu1 %v508_v1  ;;  %v325_v55 = vld [vmem:[%s768_s4] ss:$0 sm:$0xff]  ;;  %p487_p0 = scmp.ne.s32.totalorder %s317_s30, %s486_s5  ;;  %p492_p2 = scmp.lt.s32.totalorder %s486_s5, %s486_s5 }
  0x1a   :  { %403 = vmatpush3.msra.mxu0 %v31_v23  ;;  %434 = vmatpush3.msra.mxu1 %v127_v24  ;;  %v326_v60 = vld [vmem:[%s770_s6] ss:$0 sm:$0xff] }
  0x1b   :  { %404 = vmatprep.subr.mxu0 %v508_v1  ;;  %435 = vmatprep.subr.mxu1 %v508_v1  ;;  %p493_p3 = por %p492_p2, %p491_p1 }
  0x1c   :  { %405 = vmatpush3.msra.mxu0 %v30_v25  ;;  %436 = vmatpush3.msra.mxu1 %v126_v26 }
  0x1d   :  { %406 = vmatprep.subr.mxu0 %v508_v1  ;;  %437 = vmatprep.subr.mxu1 %v508_v1  ;;  %p494_p4 = pnand %p493_p3, %p487_p0 }
  0x1e   :  { %407 = vmatpush3.msra.mxu0 %v29_v27  ;;  %438 = vmatpush3.msra.mxu1 %v125_v28 }
  0x1f   :  { %408 = vmatprep.subr.mxu0 %v508_v1  ;;  %439 = vmatprep.subr.mxu1 %v508_v1 }
  0x20   :  { %409 = vmatpush3.msra.mxu0 %v28_v29  ;;  %440 = vmatpush3.msra.mxu1 %v124_v31 }
  0x21   :  { %411 = vmatmul.mubr.f32.vlgmr.msra.gmra.mxu0 %v27_v30  ;;  %448 = vmatprep.subr.mxu0 %v508_v1 }
  0x22   :  { %480 = vmatprep.mubr.msk.f32.mxu0 %vm509_vm0, %v508_v1  ;;  %441 = vmatprep.subr.mxu1 %v508_v1 }
  0x23   :  { %442 = vmatpush3.msra.mxu1 %v123_v32  ;;  %449 = vmatpush3.msra.mxu0 %v231_v34 }
  0x24   :  { %443 = vmatprep.subr.mxu1 %v508_v1  ;;  %450 = vmatprep.subr.mxu0 %v508_v1 }
  0x25   :  { %444 = vmatpush3.msra.mxu1 %v122_v33  ;;  %451 = vmatpush3.msra.mxu0 %v230_v35 }
  0x26   :  { %452 = vmatprep.subr.mxu0 %v508_v1 }
  0x27   :  { %453 = vmatpush3.msra.mxu0 %v229_v36 }
  0x28   :  { %454 = vmatprep.subr.mxu0 %v508_v1 }
  0x29   :  { %455 = vmatpush3.msra.mxu0 %v228_v37 }
  0x2a   :  { %456 = vmatprep.subr.mxu0 %v508_v1 }
  0x2b   :  { %457 = vmatpush3.msra.mxu0 %v227_v38 }
  0x2c   :  { %458 = vmatprep.subr.mxu0 %v508_v1 }
  0x2d   :  { %459 = vmatpush3.msra.mxu0 %v226_v39 }
  0x2e   :  { %460 = vmatprep.subr.mxu0 %v508_v1 }
  0x2f   :  { %461 = vmatpush3.msra.mxu0 %v225_v40 }
  0x30   :  { %462 = vmatprep.subr.mxu0 %v508_v1 }
  0x31   :  { %463 = vmatpush3.msra.mxu0 %v224_v41 }
  0x32   :  { %464 = vmatprep.subr.mxu0 %v508_v1 }
  0x33   :  { %465 = vmatpush3.msra.mxu0 %v223_v42 }
  0x34   :  { %466 = vmatprep.subr.mxu0 %v508_v1 }
  0x35   :  { %467 = vmatpush3.msra.mxu0 %v222_v43 }
  0x36   :  { %468 = vmatprep.subr.mxu0 %v508_v1 }
  0x37   :  { %469 = vmatpush3.msra.mxu0 %v221_v44 }
  0x38   :  { %470 = vmatprep.subr.mxu0 %v508_v1 }
  0x39   :  { %471 = vmatpush3.msra.mxu0 %v220_v45 }
  0x3a   :  { %472 = vmatprep.subr.mxu0 %v508_v1 }
  0x3b   :  { %473 = vmatpush3.msra.mxu0 %v219_v46 }
  0x3c   :  { %474 = vmatprep.subr.mxu0 %v508_v1 }
  0x3d   :  { %475 = vmatpush3.msra.mxu0 %v218_v52 }
  0x3e   :  { %476 = vmatprep.subr.mxu0 %v508_v1 }
  0x3f   :  { %477 = vmatpush3.msra.mxu0 %v217_v53 }
  0x40   :  { %478 = vmatprep.subr.mxu0 %v508_v1 }
  0x41   :  { %479 = vmatpush3.msra.mxu0 %v216_v54 }
  0xe1   :  { %v117_v48 = vpop.f32.mrf.mxu0 }
  0xe2   :  { %v118_v49 = vadd.f32 %v324_v47, %v117_v48 }
  0xe3   :  { %v412_v50 = vpop.f32.mrf.mxu0 }
  0xe4   :  { %v121_v51 = vmax.f32 %v118_v49, 0.0 }
  0xe6   :  { %446 = vmatmul.mubr.f32.vlgmr.msra.gmra.mxu1 %v121_v51 }
 0x1a6   :  { %v211_v56 = vpop.f32.mrf.mxu1 }
 0x1a7   :  { %v212_v57 = vadd.f32 %v325_v55, %v211_v56 }
 0x1a8   :  { %v447_v58 = vpop.f32.mrf.mxu1 }
 0x1a9   :  { %v215_v59 = vmax.f32 %v212_v57, 0.0 }
 0x1ab   :  { %481 = vmatmul.mubr.f32.vlgmr.msra.gmra.mxu0 %v215_v59 }
 0x26b   :  { %v305_v61 = vpop.f32.mrf.mxu0 }
 0x26c   :  { %v306_v62 = vadd.f32 %v326_v60, %v305_v61 }
 0x26d   :  { %v482_v63 = vpop.f32.mrf.mxu0 }
 0x26e   :  { %309 = vst [vmem:[#allocation2] sm:$0xff] %v306_v62 }
 0x26f   :  { %497 = shalt.err (!%p494_p4)
}
 0x270   :  { %319 = dma.vmem_to_hbm [thread:$0]  %s317_s30, 128, %s771_s7, [#allocation3]  }
 0x271   :  { %506 = dma.done.wait [#allocation3], 128  }
 0x272   :  { %507 = vsyncadd [#allocation3], 4294967168 }
 0x273   :  { %323 = vsyncpa [#allocation3], 1 }

</bundles_post_ra>
